<compile_context>
chip_gen: v6e
topology: v6e:2x2x1
jax: 0.10.0
libtpu: 0.0.40
codegen_flags: <defaults>
</compile_context>

<pallas_src>
import jax
import jax.numpy as jnp
from jax.experimental import pallas as pl
from jax.experimental.pallas import tpu as pltpu


def _round_up(x, m):
    return (x + m - 1) // m * m


def _cdiv(a, b):
    return -(-a // b)


# --------------------------------------------------------------------------
# Kernel: 3 MXU dots per grid step on the width-folded space-to-depth input.
#   body_ref : (th, Wp, K2)  bf16   T rows [t*th, t*th+th)
#   halo_ref : (1,  Wp, K2)  bf16   T row   t*th+th           (row halo)
#   r_ref    : (2,  K2, N )  bf16   tap-regrouped [[Wr,Wi],[-Wi,Wr]] RHS
#   b_ref    : (1,  N     )  f32    packed bias [b_r | b_i]
#   o_ref    : (th, Wp, N )  bf16   packed [real | imag] output tile
# --------------------------------------------------------------------------
def _cdown2_kernel(body_ref, halo_ref, r_ref, b_ref, o_ref):
    th, wp, k2 = body_ref.shape
    n = o_ref.shape[-1]

    r0 = r_ref[0]                       # taps with row offset oh = 0
    r1 = r_ref[1]                       # taps with row offset oh = 1

    # oh = 0 : all th rows of the body block (leading-dim view; tile-aligned
    # reshape because wp % 8 == 0 -> no relayout copies).
    acc = jnp.dot(body_ref[...].reshape(th * wp, k2), r0,
                  preferred_element_type=jnp.float32)

    # oh = 1 : body rows [1, th) plus the 1-row halo block.
    halo = jnp.dot(halo_ref[...].reshape(wp, k2), r1,
                   preferred_element_type=jnp.float32)
    if th > 1:
        top = jnp.dot(body_ref[1:th].reshape((th - 1) * wp, k2), r1,
                      preferred_element_type=jnp.float32)
        acc = acc + jnp.concatenate([top, halo], axis=0)
    else:
        acc = acc + halo

    acc = acc + b_ref[...]              # broadcast (1, N) bias (VPU)
    o_ref[...] = acc.reshape(th, wp, n).astype(o_ref.dtype)


# --------------------------------------------------------------------------
# Generation-aware VMEM budgets (v5e/v6e: 128 MiB physical, v7x: 64 MiB).
# --------------------------------------------------------------------------
def _vmem_budgets():
    cap = 64 * (1 << 20)                      # conservative default (v7x)
    try:
        info = pltpu.get_tpu_info()
        cap = int(getattr(info, "vmem_capacity_bytes", cap)) or cap
    except Exception:
        pass
    budget = min(64 * (1 << 20), cap // 2)     # tile-picker budget
    limit = min(96 * (1 << 20), (3 * cap) // 4)
    return budget, max(limit, budget)


# --------------------------------------------------------------------------
# Row-tile picker: counts double-buffered blocks, weights, bias, bf16 output
# and the in-kernel f32 accumulator / dot temporaries.
# --------------------------------------------------------------------------
def _pick_row_tile(B, Ho, Wp, K2, N, budget_bytes):
    def vmem_bytes(th):
        body = 2 * th * Wp * K2 * 2           # bf16 body block, double-buffered
        halo = 2 * Wp * K2 * 2                # bf16 halo row, double-buffered
        wts = 2 * 2 * K2 * N * 2              # RHS weights
        bias = 2 * N * 4
        outb = 2 * th * Wp * N * 2            # bf16 output block, double-buffered
        acc = 3 * th * Wp * N * 4             # f32 accumulator + temporaries
        return body + halo + wts + bias + outb + acc

    th = 1
    for cand in range(1, Ho + 1):
        if vmem_bytes(cand) <= budget_bytes:
            th = cand

    # Prefer an even grid count >= 2 so both v7x TensorCores get balanced work,
    # without giving up more than ~2x of the VMEM-optimal tile.
    def grid_ok(cand):
        g = B * _cdiv(Ho, cand)
        return g >= 2 and g % 2 == 0

    if not grid_ok(th):
        for cand in range(th - 1, 0, -1):
            if grid_ok(cand) and 2 * cand >= th:
                th = cand
                break
    return th


# --------------------------------------------------------------------------
# CDown2 forward: complex 3x3 / stride-2 / pad-1 conv, params passed explicitly.
# --------------------------------------------------------------------------
def cdown2_forward(x, w_r, w_i, b_r, b_i):
    """x: (B, C_in, H, W) complex64; w_*: (C_out, C_in, 3, 3); b_*: (C_out,)."""
    B, C, H, W = x.shape
    assert H % 2 == 0 and W % 2 == 0
    Co = w_r.shape[0]
    Ho, Wo = H // 2, W // 2

    K1 = 8 * C                 # space-to-depth channels with real||imag merged
    K2 = 2 * K1                # + width halo folded into the lane dim
    N = 2 * Co                 # packed [real | imag] output lanes (no padding)
    Wp = _round_up(Wo, 8)      # sublane-aligned output width

    budget, vmem_limit = _vmem_budgets()
    th = _pick_row_tile(B, Ho, Wp, K2, N, budget)
    n_t = _cdiv(Ho, th)
    Ho_pad = n_t * th          # non-divisor tiles handled by padding + crop

    # ---- input prep: NCHW complex -> NHWC real||imag, bf16 ----
    xr = jnp.real(x).transpose(0, 2, 3, 1)
    xi = jnp.imag(x).transpose(0, 2, 3, 1)
    z = jnp.concatenate([xr, xi], axis=-1).astype(jnp.bfloat16)   # (B,H,W,2C)

    # pad=1, 2x2 space-to-depth -> S[b, hs, ws, (dh, dw, cz)]  (B, Ho+1, Wo+1, 8C)
    zp = jnp.pad(z, ((0, 0), (1, 1), (1, 1), (0, 0)))
    s = zp.reshape(B, Ho + 1, 2, Wo + 1, 2, 2 * C)
    s = s.transpose(0, 1, 3, 2, 4, 5).reshape(B, Ho + 1, Wo + 1, K1)

    # fold the width halo into lanes: T[b,hs,wo,:] = [S[..,wo,:], S[..,wo+1,:]]
    # and pad rows/cols so every block/reshape in the kernel is tile aligned.
    s = jnp.pad(s, ((0, 0), (0, Ho_pad - Ho), (0, Wp - Wo), (0, 0)))
    t = jnp.concatenate([s[:, :, :Wp, :], s[:, :, 1:Wp + 1, :]], axis=-1)
    # t: (B, Ho_pad + 1, Wp, K2), bf16

    # ---- RHS: complex-combined, tap-regrouped weights (2, K2, N) ----
    wr_t = w_r.astype(jnp.float32).transpose(1, 2, 3, 0)           # (C,3,3,Co)
    wi_t = w_i.astype(jnp.float32).transpose(1, 2, 3, 0)
    wc = jnp.concatenate([
        jnp.concatenate([wr_t, wi_t], axis=-1),    # real input channels
        jnp.concatenate([-wi_t, wr_t], axis=-1),   # imag input channels
    ], axis=0)                                     # (2C, 3, 3, N)
    wc = jnp.pad(wc, ((0, 0), (0, 1), (0, 1), (0, 0)))             # taps 3 -> 4
    # (cz, kh, kw, n) -> (oh, ow, dh, dw, cz, n) with kh = 2*oh+dh, kw = 2*ow+dw
    r = wc.reshape(2 * C, 2, 2, 2, 2, N).transpose(1, 3, 2, 4, 0, 5)
    r = r.reshape(2, K2, N).astype(jnp.bfloat16)

    bias = jnp.concatenate([b_r, b_i]).astype(jnp.float32).reshape(1, N)

    out = pl.pallas_call(
        _cdown2_kernel,
        out_shape=jax.ShapeDtypeStruct((B, Ho_pad, Wp, N), jnp.bfloat16),
        grid_spec=pltpu.PrefetchScalarGridSpec(
            num_scalar_prefetch=0,
            grid=(B, n_t),
            in_specs=[
                # body rows [t*th, t*th+th)
                pl.BlockSpec((None, th, Wp, K2), lambda b, ti: (b, ti, 0, 0)),
                # 1-row halo = first row of the next tile (same array, 2nd spec)
                pl.BlockSpec((None, 1, Wp, K2),
                             lambda b, ti: (b, (ti + 1) * th, 0, 0)),
                pl.BlockSpec((2, K2, N), lambda b, ti: (0, 0, 0)),
                pl.BlockSpec((1, N), lambda b, ti: (0, 0)),
            ],
            out_specs=pl.BlockSpec((None, th, Wp, N),
                                   lambda b, ti: (b, ti, 0, 0)),
        ),
        compiler_params=pltpu.CompilerParams(
            dimension_semantics=("parallel", "parallel"),
            vmem_limit_bytes=vmem_limit,
        ),
    )(t, t, r, bias)

    # ---- epilogue: crop padding, slice channels BEFORE transposing, then a
    # single NCHW + complex64 conversion at the module boundary. ----
    out = out[:, :Ho, :Wo, :]
    real = out[..., :Co].transpose(0, 3, 1, 2).astype(jnp.float32)
    imag = out[..., Co:].transpose(0, 3, 1, 2).astype(jnp.float32)
    return jax.lax.complex(real, imag)


# --------------------------------------------------------------------------
# Pure-JAX reference (f32 lax conv) for the correctness check.
# --------------------------------------------------------------------------
def _ref_forward(x, w_r, w_i, b_r, b_i):
    def conv(inp, w):
        return jax.lax.conv_general_dilated(
            inp, w, window_strides=(2, 2), padding=((1, 1), (1, 1)),
            dimension_numbers=("NCHW", "OIHW", "NCHW"))
    x_r = jnp.real(x).astype(jnp.float32)
    x_i = jnp.imag(x).astype(jnp.float32)
    br = b_r[None, :, None, None]
    bi = b_i[None, :, None, None]
    real = conv(x_r, w_r) - conv(x_i, w_i) + br
    imag = conv(x_r, w_i) + conv(x_i, w_r) + bi
    return (real + 1j * imag).astype(jnp.complex64)


if __name__ == "__main__":
    B, C_in, H, W = 2, 4, 16, 16
    C_out = 8

    key = jax.random.PRNGKey(0)
    k1, k2, k3, k4, k5, k6 = jax.random.split(key, 6)

    fan_in = C_in * 3 * 3
    scale = 1.0 / (fan_in ** 0.5)
    w_r = jax.random.uniform(k1, (C_out, C_in, 3, 3), jnp.float32, -scale, scale)
    w_i = jax.random.uniform(k2, (C_out, C_in, 3, 3), jnp.float32, -scale, scale)
    b_r = jax.random.uniform(k3, (C_out,), jnp.float32, -scale, scale)
    b_i = jax.random.uniform(k4, (C_out,), jnp.float32, -scale, scale)

    x_real = jax.random.normal(k5, (B, C_in, H, W), jnp.float32)
    x_imag = jax.random.normal(k6, (B, C_in, H, W), jnp.float32)
    x = (x_real + 1j * x_imag).astype(jnp.complex64)

    out = jax.jit(cdown2_forward)(x, w_r, w_i, b_r, b_i)
    out = jax.block_until_ready(out)

    ref = _ref_forward(x, w_r, w_i, b_r, b_i)
    assert out.shape == (B, C_out, H // 2, W // 2), out.shape
    # bf16 MXU operands / bf16 writeback with f32 accumulation.
    assert jnp.allclose(out, ref, atol=2e-2, rtol=1e-2), "mismatch vs reference"

    print("KERNEL_OK")
</pallas_src>

<mosaic_0001>
module attributes {stable_mosaic.version = 11 : i64} {
  func.func @_cdown2_kernel(%arg0: i32, %arg1: i32, %arg2: memref<1x8x8x64xbf16, #tpu.memory_space<vmem>>, %arg3: memref<1x1x8x64xbf16, #tpu.memory_space<vmem>>, %arg4: memref<2x64x16xbf16, #tpu.memory_space<vmem>>, %arg5: memref<1x16xf32, #tpu.memory_space<vmem>>, %arg6: memref<1x8x8x16xbf16, #tpu.memory_space<vmem>>) attributes {dimension_semantics = [#tpu.dimension_semantics<parallel>, #tpu.dimension_semantics<parallel>], iteration_bounds = array<i64: 2, 1>, scalar_prefetch = 0 : i64, scratch_operands = 0 : i64, tpu.core_type = #tpu.core_type<tc>, window_params = [{transform_indices = @transform_0, window_bounds = array<i64: 1, 8, 8, 64>}, {transform_indices = @transform_1, window_bounds = array<i64: 1, 1, 8, 64>}, {pipeline_mode = #tpu.pipeline_mode<synchronous>, transform_indices = @transform_2, window_bounds = array<i64: 2, 64, 16>}, {pipeline_mode = #tpu.pipeline_mode<synchronous>, transform_indices = @transform_3, window_bounds = array<i64: 1, 16>}, {transform_indices = @transform_4, window_bounds = array<i64: 1, 8, 8, 16>}]} {
    %c0 = arith.constant 0 : index
    %c0_0 = arith.constant 0 : index
    %c0_1 = arith.constant 0 : index
    %0 = vector.load %arg4[%c0, %c0_0, %c0_1] : memref<2x64x16xbf16, #tpu.memory_space<vmem>>, vector<1x64x16xbf16>
    %1 = vector.shape_cast %0 : vector<1x64x16xbf16> to vector<64x16xbf16>
    %c1 = arith.constant 1 : index
    %c0_2 = arith.constant 0 : index
    %c0_3 = arith.constant 0 : index
    %2 = vector.load %arg4[%c1, %c0_2, %c0_3] : memref<2x64x16xbf16, #tpu.memory_space<vmem>>, vector<1x64x16xbf16>
    %3 = vector.shape_cast %2 : vector<1x64x16xbf16> to vector<64x16xbf16>
    %c0_4 = arith.constant 0 : index
    %c0_5 = arith.constant 0 : index
    %c0_6 = arith.constant 0 : index
    %c0_7 = arith.constant 0 : index
    %4 = vector.load %arg2[%c0_4, %c0_5, %c0_6, %c0_7] : memref<1x8x8x64xbf16, #tpu.memory_space<vmem>>, vector<1x8x8x64xbf16>
    %5 = vector.shape_cast %4 : vector<1x8x8x64xbf16> to vector<8x8x64xbf16>
    %6 = vector.shape_cast %5 : vector<8x8x64xbf16> to vector<64x64xbf16>
    %cst = arith.constant dense<0.000000e+00> : vector<64x16xf32>
    %7 = tpu.matmul %6, %1, %cst {dimension_numbers = #tpu.dot_dimension_numbers<[1], [0], [0], [1], [0, 0, 1, 1], [], []>} : vector<64x64xbf16>, vector<64x16xbf16>, vector<64x16xf32> -> vector<64x16xf32>
    %c0_8 = arith.constant 0 : index
    %c0_9 = arith.constant 0 : index
    %c0_10 = arith.constant 0 : index
    %c0_11 = arith.constant 0 : index
    %8 = vector.load %arg3[%c0_8, %c0_9, %c0_10, %c0_11] : memref<1x1x8x64xbf16, #tpu.memory_space<vmem>>, vector<1x1x8x64xbf16>
    %9 = vector.shape_cast %8 : vector<1x1x8x64xbf16> to vector<1x8x64xbf16>
    %10 = vector.shape_cast %9 : vector<1x8x64xbf16> to vector<8x64xbf16>
    %cst_12 = arith.constant dense<0.000000e+00> : vector<8x16xf32>
    %11 = tpu.matmul %10, %3, %cst_12 {dimension_numbers = #tpu.dot_dimension_numbers<[1], [0], [0], [1], [0, 0, 1, 1], [], []>} : vector<8x64xbf16>, vector<64x16xbf16>, vector<8x16xf32> -> vector<8x16xf32>
    %c0_13 = arith.constant 0 : index
    %c1_14 = arith.constant 1 : index
    %c0_15 = arith.constant 0 : index
    %c0_16 = arith.constant 0 : index
    %12 = vector.load %arg2[%c0_13, %c1_14, %c0_15, %c0_16] : memref<1x8x8x64xbf16, #tpu.memory_space<vmem>>, vector<1x7x8x64xbf16>
    %13 = vector.shape_cast %12 : vector<1x7x8x64xbf16> to vector<7x8x64xbf16>
    %14 = vector.shape_cast %13 : vector<7x8x64xbf16> to vector<56x64xbf16>
    %cst_17 = arith.constant dense<0.000000e+00> : vector<56x16xf32>
    %15 = tpu.matmul %14, %3, %cst_17 {dimension_numbers = #tpu.dot_dimension_numbers<[1], [0], [0], [1], [0, 0, 1, 1], [], []>} : vector<56x64xbf16>, vector<64x16xbf16>, vector<56x16xf32> -> vector<56x16xf32>
    %16 = tpu.concatenate %15, %11 in 0 : vector<56x16xf32>, vector<8x16xf32> -> vector<64x16xf32>
    %17 = arith.addf %7, %16 : vector<64x16xf32>
    %c0_18 = arith.constant 0 : index
    %c0_19 = arith.constant 0 : index
    %18 = vector.load %arg5[%c0_18, %c0_19] : memref<1x16xf32, #tpu.memory_space<vmem>>, vector<1x16xf32>
    %19 = vector.broadcast %18 : vector<1x16xf32> to vector<64x16xf32>
    %20 = arith.addf %17, %19 : vector<64x16xf32>
    %21 = vector.shape_cast %20 : vector<64x16xf32> to vector<8x8x16xf32>
    %22 = arith.truncf %21 : vector<8x8x16xf32> to vector<8x8x16xbf16>
    %c0_20 = arith.constant 0 : index
    %c0_21 = arith.constant 0 : index
    %c0_22 = arith.constant 0 : index
    %c0_23 = arith.constant 0 : index
    %23 = vector.load %arg6[%c0_20, %c0_21, %c0_22, %c0_23] : memref<1x8x8x16xbf16, #tpu.memory_space<vmem>>, vector<1x8x8x16xbf16>
    %24 = vector.shape_cast %23 : vector<1x8x8x16xbf16> to vector<8x8x16xbf16>
    %25 = vector.shape_cast %22 : vector<8x8x16xbf16> to vector<1x8x8x16xbf16>
    tpu.vector_store %arg6[%c0_20, %c0_21, %c0_22, %c0_23], %25 {strides = array<i32>} : memref<1x8x8x16xbf16, #tpu.memory_space<vmem>>, vector<1x8x8x16xbf16>,
    return
  }
  func.func @transform_0(%arg0: i32, %arg1: i32) -> (i32, i32, i32, i32) {
    %c0_i32 = arith.constant 0 : i32
    %c0_i32_0 = arith.constant 0 : i32
    %c0_i32_1 = arith.constant 0 : i32
    return %arg0, %arg1, %c0_i32, %c0_i32_0 : i32, i32, i32, i32
  }
  func.func @transform_1(%arg0: i32, %arg1: i32) -> (i32, i32, i32, i32) {
    %c1_i32 = arith.constant 1 : i32
    %0 = arith.addi %arg1, %c1_i32 : i32
    %c8_i32 = arith.constant 8 : i32
    %1 = arith.muli %0, %c8_i32 : i32
    %c0_i32 = arith.constant 0 : i32
    %c0_i32_0 = arith.constant 0 : i32
    %c0_i32_1 = arith.constant 0 : i32
    return %arg0, %1, %c0_i32, %c0_i32_0 : i32, i32, i32, i32
  }
  func.func @transform_2(%arg0: i32, %arg1: i32) -> (i32, i32, i32) {
    %c0_i32 = arith.constant 0 : i32
    %c0_i32_0 = arith.constant 0 : i32
    %c0_i32_1 = arith.constant 0 : i32
    %c0_i32_2 = arith.constant 0 : i32
    return %c0_i32, %c0_i32_0, %c0_i32_1 : i32, i32, i32
  }
  func.func @transform_3(%arg0: i32, %arg1: i32) -> (i32, i32) {
    %c0_i32 = arith.constant 0 : i32
    %c0_i32_0 = arith.constant 0 : i32
    %c0_i32_1 = arith.constant 0 : i32
    return %c0_i32, %c0_i32_0 : i32, i32
  }
  func.func @transform_4(%arg0: i32, %arg1: i32) -> (i32, i32, i32, i32) {
    %c0_i32 = arith.constant 0 : i32
    %c0_i32_0 = arith.constant 0 : i32
    %c0_i32_1 = arith.constant 0 : i32
    return %arg0, %arg1, %c0_i32, %c0_i32_0 : i32, i32, i32, i32
  }
}

</mosaic_0001>

<bundles_post_ra>
// kernel: custom-call.1
= control target key start
LH: loop header
LB: loop body
LE: loop exit
PB: predicated region body
PF: predicated region fallthrough
CT: control target
= control target key end

     0   :  { %s51_s0 = inlined_call_operand.hbm [shape: c64[2,4,16,16], index: 0, kind: input, shape index: {}]   ;;  %s52_s1 = inlined_call_operand.vmem [shape: f32[2,4,16,16], index: 1, kind: output, shape index: {}]  }
   0x1   :  { %s2_s8 = scalar_lea.hbm %s51_s0, 2048 }
   0x2   :  { %3 = vsyncpa [#allocation0], 0  ;;  %s4_s11 = sshll.u32 %s52_s1, 4  ;;  %s5_s11 = int_to_ptr.vmem [resolvable:$true] %s4_s11 }
   0x3   :  { %s20_s12 = scalar_lea.vmem %s5_s11, 2048  ;;  %p25_p1 = scmp.lt.s32.totalorder %s5_s11, %s5_s11 }
   0x4   :  { %p21_p0 = scmp.ne.s32.totalorder %s5_s11, %s20_s12  ;;  %p26_p2 = scmp.lt.s32.totalorder %s20_s12, %s20_s12 }
   0x6   :  { %p27_p3 = por %p26_p2, %p25_p1 }
   0x8   :  { %p28_p4 = pnand %p27_p3, %p21_p0 }
   0xa   :  { %31 = shalt.err (!%p28_p4)  }
   0xb   :  { %7 = dma.hbm_to_vmem [thread:$0]  %s2_s8, 2048, %s5_s11, [#allocation0] }
   0xc   :  { %33 = dma.done.wait [#allocation0], 2048  }
   0xd   :  { %34 = vsyncadd [#allocation0], 4294965248 }
   0xe   :  { %9 = vsyncpa [#allocation0], 1 }

// kernel: custom-call
= control target key start
LH: loop header
LB: loop body
LE: loop exit
PB: predicated region body
PF: predicated region fallthrough
CT: control target
= control target key end

     0   :  { %2 = vsyncpa [#allocation0], 0  ;;  %s47_s0 = inlined_call_operand.hbm [shape: c64[2,4,16,16], index: 0, kind: input, shape index: {}]   ;;  %s48_s1 = inlined_call_operand.vmem [shape: f32[2,4,16,16], index: 1, kind: output, shape index: {}]  }
   0x1   :  { %s3_s8 = sshll.u32 %s48_s1, 4  ;;  %s4_s8 = int_to_ptr.vmem [resolvable:$true] %s3_s8 }
   0x2   :  { %s17_s9 = scalar_lea.vmem %s4_s8, 2048  ;;  %p22_p1 = scmp.lt.s32.totalorder %s4_s8, %s4_s8 }
   0x3   :  { %p18_p0 = scmp.ne.s32.totalorder %s4_s8, %s17_s9  ;;  %p23_p2 = scmp.lt.s32.totalorder %s17_s9, %s17_s9 }
   0x5   :  { %p24_p3 = por %p23_p2, %p22_p1 }
   0x7   :  { %p25_p4 = pnand %p24_p3, %p18_p0 }
   0x9   :  { %28 = shalt.err (!%p25_p4)  }
   0xa   :  { %6 = dma.hbm_to_vmem [thread:$0]  %s47_s0, 2048, %s4_s8, [#allocation0] }
   0xb   :  { %29 = dma.done.wait [#allocation0], 2048  }
   0xc   :  { %30 = vsyncadd [#allocation0], 4294965248 }
   0xd   :  { %8 = vsyncpa [#allocation0], 1 }

// kernel: custom-call.2
= control target key start
LH: loop header
LB: loop body
LE: loop exit
PB: predicated region body
PF: predicated region fallthrough
CT: control target
= control target key end

     0   :  { %s412_s0 = inlined_call_operand.vmem [shape: f32[2,8,8,8], index: 0, kind: input, shape index: {}]   ;;  %s413_s2 = inlined_call_operand.vmem [shape: c64[2,8,8,8], index: 2, kind: output, shape index: {}]   ;;  %s414_s1 = inlined_call_operand.vmem [shape: f32[2,8,8,8], index: 1, kind: input, shape index: {}]  }
   0x1   :  { %v5_v0 = vld [vmem:[%s412_s0] sm:$0xff]  ;;  %v144_v1 = vld [vmem:[%s412_s0 + $0x8] sm:$0xff]  ;;  %v146_v2 = vld [vmem:[%s412_s0 + $0x10] sm:$0xff] }
   0x2   :  { %6 = vst [vmem:[%s413_s2] sm:$0xff] %v5_v0  ;;  %145 = vst [vmem:[%s413_s2 + $0x8] sm:$0xff] %v144_v1  ;;  %v148_v3 = vld [vmem:[%s412_s0 + $0x18] sm:$0xff]  ;;  %v150_v4 = vld [vmem:[%s412_s0 + $0x20] sm:$0xff] }
   0x3   :  { %147 = vst [vmem:[%s413_s2 + $0x10] sm:$0xff] %v146_v2  ;;  %v152_v5 = vld [vmem:[%s412_s0 + $0x28] sm:$0xff]  ;;  %149 = vst [vmem:[%s413_s2 + $0x18] sm:$0xff] %v148_v3  ;;  %v154_v6 = vld [vmem:[%s412_s0 + $0x30] sm:$0xff] }
   0x4   :  { %151 = vst [vmem:[%s413_s2 + $0x20] sm:$0xff] %v150_v4  ;;  %153 = vst [vmem:[%s413_s2 + $0x28] sm:$0xff] %v152_v5  ;;  %v156_v7 = vld [vmem:[%s412_s0 + $0x38] sm:$0xff]  ;;  %v158_v8 = vld [vmem:[%s412_s0 + $0x40] sm:$0xff] }
   0x5   :  { %155 = vst [vmem:[%s413_s2 + $0x30] sm:$0xff] %v154_v6  ;;  %157 = vst [vmem:[%s413_s2 + $0x38] sm:$0xff] %v156_v7  ;;  %v160_v9 = vld [vmem:[%s412_s0 + $0x48] sm:$0xff]  ;;  %v162_v10 = vld [vmem:[%s412_s0 + $0x50] sm:$0xff] }
   0x6   :  { %159 = vst [vmem:[%s413_s2 + $0x40] sm:$0xff] %v158_v8  ;;  %v164_v11 = vld [vmem:[%s412_s0 + $0x58] sm:$0xff]  ;;  %161 = vst [vmem:[%s413_s2 + $0x48] sm:$0xff] %v160_v9  ;;  %v166_v12 = vld [vmem:[%s412_s0 + $0x60] sm:$0xff] }
   0x7   :  { %163 = vst [vmem:[%s413_s2 + $0x50] sm:$0xff] %v162_v10  ;;  %165 = vst [vmem:[%s413_s2 + $0x58] sm:$0xff] %v164_v11  ;;  %v168_v13 = vld [vmem:[%s412_s0 + $0x68] sm:$0xff]  ;;  %v170_v14 = vld [vmem:[%s412_s0 + $0x70] sm:$0xff] }
   0x8   :  { %167 = vst [vmem:[%s413_s2 + $0x60] sm:$0xff] %v166_v12  ;;  %169 = vst [vmem:[%s413_s2 + $0x68] sm:$0xff] %v168_v13  ;;  %v172_v15 = vld [vmem:[%s412_s0 + $0x78] sm:$0xff]  ;;  %v67_v16 = vld [vmem:[%s414_s1] sm:$0xff] }
   0x9   :  { %171 = vst [vmem:[%s413_s2 + $0x70] sm:$0xff] %v170_v14  ;;  %v175_v17 = vld [vmem:[%s414_s1 + $0x8] sm:$0xff]  ;;  %173 = vst [vmem:[%s413_s2 + $0x78] sm:$0xff] %v172_v15  ;;  %v177_v18 = vld [vmem:[%s414_s1 + $0x10] sm:$0xff] }
   0xa   :  { %174 = vst [vmem:[%s413_s2 + $0x80] sm:$0xff] %v67_v16  ;;  %176 = vst [vmem:[%s413_s2 + $0x88] sm:$0xff] %v175_v17  ;;  %v179_v19 = vld [vmem:[%s414_s1 + $0x18] sm:$0xff]  ;;  %v181_v20 = vld [vmem:[%s414_s1 + $0x20] sm:$0xff] }
   0xb   :  { %178 = vst [vmem:[%s413_s2 + $0x90] sm:$0xff] %v177_v18  ;;  %180 = vst [vmem:[%s413_s2 + $0x98] sm:$0xff] %v179_v19  ;;  %v183_v21 = vld [vmem:[%s414_s1 + $0x28] sm:$0xff]  ;;  %v185_v22 = vld [vmem:[%s414_s1 + $0x30] sm:$0xff] }
   0xc   :  { %182 = vst [vmem:[%s413_s2 + $0xa0] sm:$0xff] %v181_v20  ;;  %v187_v23 = vld [vmem:[%s414_s1 + $0x38] sm:$0xff]  ;;  %184 = vst [vmem:[%s413_s2 + $0xa8] sm:$0xff] %v183_v21  ;;  %v189_v24 = vld [vmem:[%s414_s1 + $0x40] sm:$0xff] }
   0xd   :  { %186 = vst [vmem:[%s413_s2 + $0xb0] sm:$0xff] %v185_v22  ;;  %188 = vst [vmem:[%s413_s2 + $0xb8] sm:$0xff] %v187_v23  ;;  %v191_v25 = vld [vmem:[%s414_s1 + $0x48] sm:$0xff]  ;;  %v193_v26 = vld [vmem:[%s414_s1 + $0x50] sm:$0xff] }
   0xe   :  { %190 = vst [vmem:[%s413_s2 + $0xc0] sm:$0xff] %v189_v24  ;;  %192 = vst [vmem:[%s413_s2 + $0xc8] sm:$0xff] %v191_v25  ;;  %v195_v27 = vld [vmem:[%s414_s1 + $0x58] sm:$0xff]  ;;  %v197_v28 = vld [vmem:[%s414_s1 + $0x60] sm:$0xff] }
   0xf   :  { %194 = vst [vmem:[%s413_s2 + $0xd0] sm:$0xff] %v193_v26  ;;  %v199_v29 = vld [vmem:[%s414_s1 + $0x68] sm:$0xff]  ;;  %196 = vst [vmem:[%s413_s2 + $0xd8] sm:$0xff] %v195_v27  ;;  %v201_v30 = vld [vmem:[%s414_s1 + $0x70] sm:$0xff] }
  0x10   :  { %198 = vst [vmem:[%s413_s2 + $0xe0] sm:$0xff] %v197_v28  ;;  %200 = vst [vmem:[%s413_s2 + $0xe8] sm:$0xff] %v199_v29  ;;  %v203_v31 = vld [vmem:[%s414_s1 + $0x78] sm:$0xff] }
  0x11   :  { %202 = vst [vmem:[%s413_s2 + $0xf0] sm:$0xff] %v201_v30  ;;  %204 = vst [vmem:[%s413_s2 + $0xf8] sm:$0xff] %v203_v31 }

// kernel: cdown2_forward.1
= control target key start
LH: loop header
LB: loop body
LE: loop exit
PB: predicated region body
PF: predicated region fallthrough
CT: control target
= control target key end

     0   :  { %s981_s15 = smov 0   ;;  %s983_s16 = smov 0   ;;  %s1085_s0 = inlined_call_operand.vmem [shape: bf16[2,9,8,64], index: 0, kind: input, shape index: {}, may-alias: {0,1}]   ;;  %s1086_s1 = inlined_call_operand.vmem [shape: bf16[2,9,8,64], index: 1, kind: input, shape index: {}, may-alias: {0,1}]   ;;  %s1087_s2 = inlined_call_operand.vmem [shape: bf16[2,64,16], index: 2, kind: input, shape index: {}]   ;;  %s1088_s3 = inlined_call_operand.vmem [shape: f32[1,16], index: 3, kind: input, shape index: {}]   ;;  %s1089_s4 = inlined_call_operand.vmem [shape: bf16[2,8,8,16], index: 4, kind: output, shape index: {}]  }
   0x1   :  { %s985_s17 = smov 0  }
   0x2 LB: > { %s26_s18 = sadd.s32 1, %s948_s16  ;;  %p761_p0 = scmp.ge.s32.totalorder %s952_s17, 1  ;;  %s952_s17 = sphi %s985_s17, %s14_s17   ;;  %s948_s16 = sphi %s983_s16, %s1091_s16   ;;  %s944_s15 = sphi %s981_s15, %s1090_s15  }
   0x3   : > { %p28_p1 = scmp.ge.s32.totalorder %s26_s18, 2  ;;  %p214_p2 = scmp.lt.s32.totalorder %s952_s17, 3 }
   0x5   : > { %s1093_s18 = smov (%p28_p1, %s26_s18), 0  ;;  %p215_p3 = pnand %p761_p0, %p214_p2 }
   0x6   : > { %p267_p4 = scmp.lt.s32.totalorder (!%p215_p3), %s944_s15, 1 }
   0x7   : > { %218 = sbr.rel (%p215_p3) target bundleno = 252 (0xfc), region = 36 }
   0xc   : > { %v914_v0 = vld [vmem:[%s1087_s2 + $0x38] sm:$0xff]   ;;  %v954_v1 = vmov 0.0   ;;  %v915_v2 = vld [vmem:[%s1087_s2 + $0x30] sm:$0xff]   ;;  %v916_v3 = vld [vmem:[%s1087_s2 + $0x28] sm:$0xff]   ;;  %vm955_vm0 = vmmov 0   ;;  %s1095_s15 = smov (!%p267_p4, %s944_s15), 1 }
   0xd   : > { %833 = vmatprep.subr.bf16.mxu0 %v954_v1  ;;  %845 = vmatprep.subr.bf16.mxu1 %v914_v0  ;;  %s885_s25 = smul.u32 36, %s1095_s15  ;;  %v917_v4 = vld [vmem:[%s1087_s2 + $0x20] sm:$0xff]   ;;  %vm353_vm1 = vcmask 523264   ;;  %v919_v6 = vld [vmem:[%s1087_s2 + $0x18] sm:$0xff]   ;;  %v921_v9 = vld [vmem:[%s1087_s2 + $0x10] sm:$0xff]   ;;  %s811_s23 = sshll.u32 %s1095_s15, 5 }
   0xe   : > { %834 = vmatpush3.bf16.msra.mxu0 %v914_v0  ;;  %846 = vmatpush3.bf16.msra.mxu1 %v914_v0  ;;  %v923_v12 = vld [vmem:[%s1087_s2 + $0x8] sm:$0xff]   ;;  %v925_v14 = vld [vmem:[%s1087_s2] sm:$0xff]   ;;  %s1058_s26 = scalar_lea.vmem %s1089_s4, %s811_s23  ;;  %vm643_vm2 = vcmask 125952  }
   0xf   : > { %835 = vmatprep.subr.bf16.mxu0 %v954_v1  ;;  %847 = vmatprep.subr.bf16.mxu1 %v915_v2  ;;  %s1017_s30 = scalar_lea.vmem %s1085_s0, %s885_s25  ;;  %s810_s5 = sadd.s32 32, %s885_s25  ;;  %v806_v31 = vld [vmem:[%s1088_s3] ss:$0 sm:$0xff] }
  0x10   : > { %841 = vmatprep.mubr.msk.bf16.mxu0 %vm955_vm0, %v954_v1  ;;  %v918_v5 = vld [vmem:[%s1017_s30 + $0x4] sm:$0xff]   ;;  %s289_s8 = scalar_lea.vmem %s1086_s1, %s810_s5  ;;  %v920_v8 = vld [vmem:[%s1017_s30 + $0xc] sm:$0xff]   ;;  %v922_v10 = vld [vmem:[%s1017_s30 + $0x14] sm:$0xff]  }
  0x11   : > { %853 = vmatprep.mubr.msk.bf16.mxu1 %vm353_vm1, %v918_v5  ;;  %v328_v7 = vld [vmem:[%s289_s8] sm:$0xf]  ;;  %v924_v13 = vld [vmem:[%s1017_s30 + $0x1c] ss:$0 sps:$4 sm:$0xff]   ;;  %v928_v15 = vld [vmem:[%s1017_s30 + $0x10] sm:$0xff]  }
  0x12   : > { %836 = vmatpush3.bf16.msra.mxu0 %v915_v2  ;;  %848 = vmatpush3.bf16.msra.mxu1 %v915_v2  ;;  %v926_v11 = vld [vmem:[%s1017_s30] sm:$0xff]   ;;  %v927_v16 = vld [vmem:[%s1017_s30 + $0x8] sm:$0xff]   ;;  %v929_v17 = vld [vmem:[%s1017_s30 + $0x18] sm:$0xff]  }
  0x13   : > { %837 = vmatprep.subr.bf16.mxu0 %v954_v1  ;;  %849 = vmatprep.subr.bf16.mxu1 %v916_v3 }
  0x16   : > { %838 = vmatpush3.bf16.msra.mxu0 %v916_v3  ;;  %850 = vmatpush3.bf16.msra.mxu1 %v916_v3 }
  0x17   : > { %839 = vmatprep.subr.bf16.mxu0 %v954_v1  ;;  %851 = vmatprep.subr.bf16.mxu1 %v917_v4 }
  0x1a   : > { %840 = vmatpush3.bf16.msra.mxu0 %v917_v4  ;;  %852 = vmatpush3.bf16.msra.mxu1 %v917_v4 }
  0x1b   : > { %861 = vmatprep.subr.bf16.mxu0 %v919_v6  ;;  %877 = vmatprep.subr.bf16.mxu1 %v919_v6 }
  0x1d   : > { %842 = vmatmul.mubr.msk.bf16.vlgmr.msra.gmra.mxu0 %vm353_vm1, %v328_v7  ;;  %854 = vmatmul.mubr.msk.bf16.vlgmr.msra.gmra.mxu1 %vm353_vm1, %v920_v8 }
  0x1e   : > { %862 = vmatpush3.bf16.msra.mxu0 %v919_v6  ;;  %881 = vmatpush3.bf16.msra.mxu1 %v919_v6 }
  0x1f   : > { %863 = vmatprep.subr.bf16.mxu0 %v921_v9  ;;  %878 = vmatprep.subr.bf16.mxu1 %v921_v9 }
  0x20   : > { %857 = vmatprep.mubr.msk.bf16.mxu1 %vm353_vm1, %v922_v10  ;;  %869 = vmatprep.mubr.msk.bf16.mxu0 %vm353_vm1, %v926_v11 }
  0x22   : > { %864 = vmatpush3.bf16.msra.mxu0 %v921_v9  ;;  %882 = vmatpush3.bf16.msra.mxu1 %v921_v9 }
  0x23   : > { %865 = vmatprep.subr.bf16.mxu0 %v923_v12  ;;  %879 = vmatprep.subr.bf16.mxu1 %v923_v12 }
  0x25   : > { %858 = vmatmul.mubr.msk.bf16.gmra.mxu1 %vm353_vm1, %v924_v13 }
  0x26   : > { %866 = vmatpush3.bf16.msra.mxu0 %v923_v12  ;;  %883 = vmatpush3.bf16.msra.mxu1 %v923_v12 }
  0x27   : > { %867 = vmatprep.subr.bf16.mxu0 %v925_v14  ;;  %880 = vmatprep.subr.bf16.mxu1 %v925_v14 }
  0x28   : > { %873 = vmatprep.mubr.msk.bf16.mxu1 %vm353_vm1, %v928_v15 }
  0x2a   : > { %868 = vmatpush3.bf16.msra.mxu0 %v925_v14  ;;  %884 = vmatpush3.bf16.msra.mxu1 %v925_v14 }
  0x2d   : > { %870 = vmatmul.mubr.msk.bf16.vlgmr.msra.gmra.mxu0 %vm353_vm1, %v927_v16  ;;  %874 = vmatmul.mubr.msk.bf16.vlgmr.msra.gmra.mxu1 %vm353_vm1, %v929_v17 }
  0xdd   : > { %v391_v18 = vpop.f32.mrf.mxu0  ;;  %v855_v19 = vpop.f32.mrf.mxu1 }
  0xdf   : > { %v843_v20 = vpop.f32.mrf.mxu0  ;;  %v469_v21 = vpop.f32.mrf.mxu1 }
  0xe1   : > { %v394_v22 = vpop.f32.mrf.mxu0  ;;  %v856_v23 = vpop.f32.mrf.mxu1 }
  0xe3   : > { %v844_v24 = vpop.f32.mrf.mxu0  ;;  %v472_v25 = vpop.f32.mrf.mxu1 }
  0xe5   : > { %v859_v26 = vpop.f32.mrf.mxu1 }
  0xe7   : > { %v485_v27 = vpop.f32.mrf.mxu1 }
  0xe9   : > { %v860_v28 = vpop.f32.mrf.mxu1 }
  0xeb   : > { %v488_v29 = vpop.f32.mrf.mxu1 }
  0xed   : > { %v871_v30 = vpop.f32.mrf.mxu0  ;;  %v875_v33 = vpop.f32.mrf.mxu1 }
  0xee   : > { %v598_v32 = vadd.f32 %v871_v30, %v855_v19  ;;  %v614_v34 = vadd.f32 %v875_v33, %v859_v26 }
  0xef   : > { %v589_v35 = vpop.f32.mrf.mxu0  ;;  %v605_v38 = vpop.f32.mrf.mxu1 }
  0xf0   : > { %v629_v36 = vadd.f32 %v806_v31, %v598_v32  ;;  %v590_v37 = vadd.f32 %v589_v35, %v469_v21  ;;  %v633_v39 = vadd.f32 %v806_v31, %v614_v34  ;;  %v606_v40 = vadd.f32 %v605_v38, %v485_v27 }
  0xf1   : > { %v872_v41 = vpop.f32.mrf.mxu0  ;;  %v876_v45 = vpop.f32.mrf.mxu1 }
  0xf2   : > { %v637_v42 = vpack.c.bf16 %v629_v36, %v629_v36  ;;  %v627_v43 = vadd.f32 %v806_v31, %v590_v37  ;;  %v601_v44 = vadd.f32 %v872_v41, %v856_v23  ;;  %v641_v46 = vpack.c.bf16 %v633_v39, %v633_v39 }
  0xf3   : > { %v631_v47 = vadd.f32 %v806_v31, %v606_v40  ;;  %v617_v48 = vadd.f32 %v876_v45, %v391_v18  ;;  %v592_v49 = vpop.f32.mrf.mxu0  ;;  %v608_v53 = vpop.f32.mrf.mxu1 }
  0xf4   : > { %646 = vst.msk [vmem:[%s1058_s26 + $0x8] sm:$0xf] %vm643_vm2, %v637_v42  ;;  %v635_v50 = vpack.c.bf16 %v627_v43, %v627_v43  ;;  %v630_v51 = vadd.f32 %v806_v31, %v601_v44  ;;  %v593_v52 = vadd.f32 %v592_v49, %v472_v25  ;;  %650 = vst.msk [vmem:[%s1058_s26 + $0x18] sm:$0xf] %vm643_vm2, %v641_v46 }
  0xf5   : > { %v639_v54 = vpack.c.bf16 %v631_v47, %v631_v47  ;;  %v634_v55 = vadd.f32 %v806_v31, %v617_v48  ;;  %v609_v56 = vadd.f32 %v608_v53, %v488_v29 }
  0xf6   : > { %644 = vst.msk [vmem:[%s1058_s26] sm:$0xf] %vm643_vm2, %v635_v50  ;;  %v638_v57 = vpack.c.bf16 %v630_v51, %v630_v51  ;;  %v628_v58 = vadd.f32 %v806_v31, %v593_v52 }
  0xf7   : > { %648 = vst.msk [vmem:[%s1058_s26 + $0x10] sm:$0xf] %vm643_vm2, %v639_v54  ;;  %v642_v59 = vpack.c.bf16 %v634_v55, %v634_v55  ;;  %v632_v60 = vadd.f32 %v806_v31, %v609_v56 }
  0xf8   : > { %647 = vst.msk [vmem:[%s1058_s26 + $0xc] sm:$0xf] %vm643_vm2, %v638_v57  ;;  %v636_v61 = vpack.c.bf16 %v628_v58, %v628_v58 }
  0xf9   : > { %651 = vst.msk [vmem:[%s1058_s26 + $0x1c] sm:$0xf] %vm643_vm2, %v642_v59  ;;  %v640_v62 = vpack.c.bf16 %v632_v60, %v632_v60 }
  0xfa   : > { %645 = vst.msk [vmem:[%s1058_s26 + $0x4] sm:$0xf] %vm643_vm2, %v636_v61 }
  0xfb   : > { %649 = vst.msk [vmem:[%s1058_s26 + $0x14] sm:$0xf] %vm643_vm2, %v640_v62 }
  0xfc PF: > { %s14_s17 = sadd.s32 1, %s952_s17   ;;  %s1090_s15 = smov %s948_s16 }
  0xfd   : > { %p11_p5 = scmp.ge.s32.totalorder %s14_s17, 4   ;;  %s1091_s16 = smov %s1093_s18 }
  0xff   :  { %13 = sbr.rel (!%p11_p5) target bundleno = 2 (0x2), region = 71 }

</bundles_post_ra>
